<compile_context>
chip_gen: v7x
topology: tpu7x:2x2x1
jax: 0.10.0
libtpu: 0.0.40
codegen_flags: <defaults>
</compile_context>

<pallas_src>
import jax
import jax.numpy as jnp
from jax.experimental import pallas as pl
from jax.experimental.pallas import tpu as pltpu

LANE = 128     # vreg lane width
SUBLANE = 8    # vreg sublane count (f32)


def _round_up(n, m):
    return ((n + m - 1) // m) * m


def _pad2d(a, rows, cols):
    r, c = a.shape
    if r == rows and c == cols:
        return a
    return jnp.pad(a, ((0, rows - r), (0, cols - c)))


def mlp_kernel(x_ref, w1_ref, b1_ref, w2_ref, b2_ref, w3_ref, b3_ref, o_ref):
    # Three MXU matmuls with f32 accumulation; bias add + tanh in f32
    # (safe on v5e which lacks bf16 VPU/EUP); recast to bf16 only at the
    # next dot boundary so the MXU sees its native dtype.
    h = jnp.dot(x_ref[...], w1_ref[...], preferred_element_type=jnp.float32)
    h = jnp.tanh(h + b1_ref[...])
    h = jnp.dot(h.astype(w2_ref.dtype), w2_ref[...],
                preferred_element_type=jnp.float32)
    h = jnp.tanh(h + b2_ref[...])
    out = jnp.dot(h.astype(w3_ref.dtype), w3_ref[...],
                  preferred_element_type=jnp.float32)
    o_ref[...] = (out + b3_ref[...]).astype(o_ref.dtype)


def mlp_forward(x, w1, b1, w2, b2, w3, b3, *, batch_tile=256,
                compute_dtype=jnp.bfloat16):
    """tanh(x@W1+b1) -> tanh(.@W2+b2) -> .@W3+b3, fused in one Pallas kernel.

    Weights are (in_features, out_features); biases are 1-D of length out_features.
    """
    B, D_in = x.shape
    H = w1.shape[1]
    C = w3.shape[1]
    out_dtype = x.dtype

    # Lane-dense padding of feature dims; batch padded to a multiple of the tile.
    Dp = _round_up(D_in, LANE)
    Hp = _round_up(H, LANE)
    Cp = _round_up(C, LANE)
    tb = min(batch_tile, _round_up(B, SUBLANE))   # adaptive tile for small batches
    Bp = _round_up(B, tb)
    grid = (Bp // tb,)

    xp = _pad2d(x, Bp, Dp).astype(compute_dtype)
    w1p = _pad2d(w1, Dp, Hp).astype(compute_dtype)
    w2p = _pad2d(w2, Hp, Hp).astype(compute_dtype)
    w3p = _pad2d(w3, Hp, Cp).astype(compute_dtype)
    b1p = _pad2d(b1.reshape(1, -1), 1, Hp).astype(jnp.float32)
    b2p = _pad2d(b2.reshape(1, -1), 1, Hp).astype(jnp.float32)
    b3p = _pad2d(b3.reshape(1, -1), 1, Cp).astype(jnp.float32)

    in_bytes = jnp.dtype(compute_dtype).itemsize
    cost = pl.CostEstimate(
        flops=2 * Bp * (Dp * Hp + Hp * Hp + Hp * Cp),
        transcendentals=2 * Bp * Hp,
        bytes_accessed=(Bp * Dp * in_bytes
                        + Bp * Cp * jnp.dtype(out_dtype).itemsize
                        + (Dp * Hp + Hp * Hp + Hp * Cp) * in_bytes
                        + (2 * Hp + Cp) * 4),
    )

    out = pl.pallas_call(
        mlp_kernel,
        out_shape=jax.ShapeDtypeStruct((Bp, Cp), out_dtype),
        grid_spec=pltpu.PrefetchScalarGridSpec(
            num_scalar_prefetch=0,
            grid=grid,
            in_specs=[
                pl.BlockSpec((tb, Dp), lambda i: (i, 0)),    # x tile (streamed)
                pl.BlockSpec((Dp, Hp), lambda i: (0, 0)),    # W1 (VMEM-resident)
                pl.BlockSpec((1, Hp), lambda i: (0, 0)),     # b1
                pl.BlockSpec((Hp, Hp), lambda i: (0, 0)),    # W2
                pl.BlockSpec((1, Hp), lambda i: (0, 0)),     # b2
                pl.BlockSpec((Hp, Cp), lambda i: (0, 0)),    # W3
                pl.BlockSpec((1, Cp), lambda i: (0, 0)),     # b3
            ],
            out_specs=pl.BlockSpec((tb, Cp), lambda i: (i, 0)),
        ),
        compiler_params=pltpu.CompilerParams(
            dimension_semantics=("parallel",),
        ),
        cost_estimate=cost,
    )(xp, w1p, b1p, w2p, b2p, w3p, b3p)

    # Strip batch/lane padding outside the kernel.
    return out[:B, :C]


def xavier_normal(key, fan_in, fan_out, dtype=jnp.float32):
    # torch.nn.init.xavier_normal_: std = gain * sqrt(2 / (fan_in + fan_out)), gain=1.
    # PyTorch weight is (out, in); we store the transpose (in, out) for x @ W.
    std = (2.0 / (fan_in + fan_out)) ** 0.5
    return (jax.random.normal(key, (fan_in, fan_out)) * std).astype(dtype)


def ref_forward_bf16(x, w1, b1, w2, b2, w3, b3):
    # Pure-JAX reference following the same bf16-matmul / f32-accumulate path.
    cd = jnp.bfloat16
    h = jnp.dot(x.astype(cd), w1.astype(cd), preferred_element_type=jnp.float32)
    h = jnp.tanh(h + b1)
    h = jnp.dot(h.astype(cd), w2.astype(cd), preferred_element_type=jnp.float32)
    h = jnp.tanh(h + b2)
    out = jnp.dot(h.astype(cd), w3.astype(cd), preferred_element_type=jnp.float32)
    return out + b3


if __name__ == "__main__":
    key = jax.random.PRNGKey(0)
    k_x, k_w1, k_w2, k_w3 = jax.random.split(key, 4)

    # Small shapes consistent with the module's forward.
    batch = 8
    input_size = 32
    hidden_dim = 64
    num_classes = 16

    x = jax.random.normal(k_x, (batch, input_size), dtype=jnp.float32)

    w1 = xavier_normal(k_w1, input_size, hidden_dim)
    b1 = jnp.full((hidden_dim,), 1e-05, dtype=jnp.float32)
    w2 = xavier_normal(k_w2, hidden_dim, hidden_dim)
    b2 = jnp.full((hidden_dim,), 1e-05, dtype=jnp.float32)
    w3 = xavier_normal(k_w3, hidden_dim, num_classes)
    b3 = jnp.full((num_classes,), 1e-05, dtype=jnp.float32)

    out = mlp_forward(x, w1, b1, w2, b2, w3, b3, batch_tile=256)
    out = jax.block_until_ready(out)
    assert out.shape == (batch, num_classes)

    # Check against a pure-JAX reference following the same bf16 matmul path.
    ref_bf16 = ref_forward_bf16(x, w1, b1, w2, b2, w3, b3)
    assert jnp.allclose(out, ref_bf16, atol=2e-3, rtol=2e-3), "mismatch vs bf16-path ref"

    # Loose sanity check against the full-f32 reference (bf16 truncation error).
    ref_f32 = jnp.tanh(x @ w1 + b1)
    ref_f32 = jnp.tanh(ref_f32 @ w2 + b2)
    ref_f32 = ref_f32 @ w3 + b3
    assert jnp.allclose(out, ref_f32, atol=5e-2, rtol=5e-2), "mismatch vs f32 ref"

    print("KERNEL_OK")
</pallas_src>

<mosaic_0001>
module attributes {stable_mosaic.version = 11 : i64} {
  func.func @mlp_kernel(%arg0: i32, %arg1: memref<8x128xbf16, #tpu.memory_space<vmem>>, %arg2: memref<128x128xbf16, #tpu.memory_space<vmem>>, %arg3: memref<1x128xf32, #tpu.memory_space<vmem>>, %arg4: memref<128x128xbf16, #tpu.memory_space<vmem>>, %arg5: memref<1x128xf32, #tpu.memory_space<vmem>>, %arg6: memref<128x128xbf16, #tpu.memory_space<vmem>>, %arg7: memref<1x128xf32, #tpu.memory_space<vmem>>, %arg8: memref<8x128xf32, #tpu.memory_space<vmem>>) attributes {dimension_semantics = [#tpu.dimension_semantics<parallel>], iteration_bounds = array<i64: 1>, scalar_prefetch = 0 : i64, scratch_operands = 0 : i64, tpu.core_type = #tpu.core_type<tc>, window_params = [{transform_indices = @transform_0, window_bounds = array<i64: 8, 128>}, {pipeline_mode = #tpu.pipeline_mode<synchronous>, transform_indices = @transform_1, window_bounds = array<i64: 128, 128>}, {pipeline_mode = #tpu.pipeline_mode<synchronous>, transform_indices = @transform_2, window_bounds = array<i64: 1, 128>}, {pipeline_mode = #tpu.pipeline_mode<synchronous>, transform_indices = @transform_3, window_bounds = array<i64: 128, 128>}, {pipeline_mode = #tpu.pipeline_mode<synchronous>, transform_indices = @transform_4, window_bounds = array<i64: 1, 128>}, {pipeline_mode = #tpu.pipeline_mode<synchronous>, transform_indices = @transform_5, window_bounds = array<i64: 128, 128>}, {pipeline_mode = #tpu.pipeline_mode<synchronous>, transform_indices = @transform_6, window_bounds = array<i64: 1, 128>}, {transform_indices = @transform_7, window_bounds = array<i64: 8, 128>}]} {
    %c0 = arith.constant 0 : index
    %c0_0 = arith.constant 0 : index
    %0 = vector.load %arg1[%c0, %c0_0] : memref<8x128xbf16, #tpu.memory_space<vmem>>, vector<8x128xbf16>
    %c0_1 = arith.constant 0 : index
    %c0_2 = arith.constant 0 : index
    %1 = vector.load %arg2[%c0_1, %c0_2] : memref<128x128xbf16, #tpu.memory_space<vmem>>, vector<128x128xbf16>
    %cst = arith.constant dense<0.000000e+00> : vector<8x128xf32>
    %2 = tpu.matmul %0, %1, %cst {dimension_numbers = #tpu.dot_dimension_numbers<[1], [0], [0], [1], [0, 0, 1, 1], [], []>} : vector<8x128xbf16>, vector<128x128xbf16>, vector<8x128xf32> -> vector<8x128xf32>
    %c0_3 = arith.constant 0 : index
    %c0_4 = arith.constant 0 : index
    %3 = vector.load %arg3[%c0_3, %c0_4] : memref<1x128xf32, #tpu.memory_space<vmem>>, vector<1x128xf32>
    %4 = vector.broadcast %3 : vector<1x128xf32> to vector<8x128xf32>
    %5 = arith.addf %2, %4 : vector<8x128xf32>
    %6 = math.tanh %5 : vector<8x128xf32>
    %7 = arith.truncf %6 : vector<8x128xf32> to vector<8x128xbf16>
    %c0_5 = arith.constant 0 : index
    %c0_6 = arith.constant 0 : index
    %8 = vector.load %arg4[%c0_5, %c0_6] : memref<128x128xbf16, #tpu.memory_space<vmem>>, vector<128x128xbf16>
    %cst_7 = arith.constant dense<0.000000e+00> : vector<8x128xf32>
    %9 = tpu.matmul %7, %8, %cst_7 {dimension_numbers = #tpu.dot_dimension_numbers<[1], [0], [0], [1], [0, 0, 1, 1], [], []>} : vector<8x128xbf16>, vector<128x128xbf16>, vector<8x128xf32> -> vector<8x128xf32>
    %c0_8 = arith.constant 0 : index
    %c0_9 = arith.constant 0 : index
    %10 = vector.load %arg5[%c0_8, %c0_9] : memref<1x128xf32, #tpu.memory_space<vmem>>, vector<1x128xf32>
    %11 = vector.broadcast %10 : vector<1x128xf32> to vector<8x128xf32>
    %12 = arith.addf %9, %11 : vector<8x128xf32>
    %13 = math.tanh %12 : vector<8x128xf32>
    %14 = arith.truncf %13 : vector<8x128xf32> to vector<8x128xbf16>
    %c0_10 = arith.constant 0 : index
    %c0_11 = arith.constant 0 : index
    %15 = vector.load %arg6[%c0_10, %c0_11] : memref<128x128xbf16, #tpu.memory_space<vmem>>, vector<128x128xbf16>
    %cst_12 = arith.constant dense<0.000000e+00> : vector<8x128xf32>
    %16 = tpu.matmul %14, %15, %cst_12 {dimension_numbers = #tpu.dot_dimension_numbers<[1], [0], [0], [1], [0, 0, 1, 1], [], []>} : vector<8x128xbf16>, vector<128x128xbf16>, vector<8x128xf32> -> vector<8x128xf32>
    %c0_13 = arith.constant 0 : index
    %c0_14 = arith.constant 0 : index
    %17 = vector.load %arg7[%c0_13, %c0_14] : memref<1x128xf32, #tpu.memory_space<vmem>>, vector<1x128xf32>
    %18 = vector.broadcast %17 : vector<1x128xf32> to vector<8x128xf32>
    %19 = arith.addf %16, %18 : vector<8x128xf32>
    %c0_15 = arith.constant 0 : index
    %c0_16 = arith.constant 0 : index
    %20 = vector.load %arg8[%c0_15, %c0_16] : memref<8x128xf32, #tpu.memory_space<vmem>>, vector<8x128xf32>
    tpu.vector_store %arg8[%c0_15, %c0_16], %19 {strides = array<i32>} : memref<8x128xf32, #tpu.memory_space<vmem>>, vector<8x128xf32>,
    return
  }
  func.func @transform_0(%arg0: i32) -> (i32, i32) {
    %c0_i32 = arith.constant 0 : i32
    %c0_i32_0 = arith.constant 0 : i32
    return %arg0, %c0_i32 : i32, i32
  }
  func.func @transform_1(%arg0: i32) -> (i32, i32) {
    %c0_i32 = arith.constant 0 : i32
    %c0_i32_0 = arith.constant 0 : i32
    %c0_i32_1 = arith.constant 0 : i32
    return %c0_i32, %c0_i32_0 : i32, i32
  }
  func.func @transform_2(%arg0: i32) -> (i32, i32) {
    %c0_i32 = arith.constant 0 : i32
    %c0_i32_0 = arith.constant 0 : i32
    %c0_i32_1 = arith.constant 0 : i32
    return %c0_i32, %c0_i32_0 : i32, i32
  }
  func.func @transform_3(%arg0: i32) -> (i32, i32) {
    %c0_i32 = arith.constant 0 : i32
    %c0_i32_0 = arith.constant 0 : i32
    %c0_i32_1 = arith.constant 0 : i32
    return %c0_i32, %c0_i32_0 : i32, i32
  }
  func.func @transform_4(%arg0: i32) -> (i32, i32) {
    %c0_i32 = arith.constant 0 : i32
    %c0_i32_0 = arith.constant 0 : i32
    %c0_i32_1 = arith.constant 0 : i32
    return %c0_i32, %c0_i32_0 : i32, i32
  }
  func.func @transform_5(%arg0: i32) -> (i32, i32) {
    %c0_i32 = arith.constant 0 : i32
    %c0_i32_0 = arith.constant 0 : i32
    %c0_i32_1 = arith.constant 0 : i32
    return %c0_i32, %c0_i32_0 : i32, i32
  }
  func.func @transform_6(%arg0: i32) -> (i32, i32) {
    %c0_i32 = arith.constant 0 : i32
    %c0_i32_0 = arith.constant 0 : i32
    %c0_i32_1 = arith.constant 0 : i32
    return %c0_i32, %c0_i32_0 : i32, i32
  }
  func.func @transform_7(%arg0: i32) -> (i32, i32) {
    %c0_i32 = arith.constant 0 : i32
    %c0_i32_0 = arith.constant 0 : i32
    return %arg0, %c0_i32 : i32, i32
  }
}

</mosaic_0001>

<bundles_post_ra>
// kernel: tpu_custom_call.1
= control target key start
LH: loop header
LB: loop body
LE: loop exit
PB: predicated region body
PF: predicated region fallthrough
CT: control target
= control target key end

     0   :  { %12 = vsyncpa [#allocation3], 0  ;;  %s863_s0 = inlined_call_operand.hbm [shape: bf16[8,128], index: 0, kind: input, shape index: {}]   ;;  %s864_s1 = inlined_call_operand.hbm [shape: bf16[128,128], index: 1, kind: input, shape index: {}]   ;;  %s865_s2 = inlined_call_operand.vmem [shape: f32[1,128], index: 2, kind: input, shape index: {}]   ;;  %s866_s3 = inlined_call_operand.hbm [shape: bf16[128,128], index: 3, kind: input, shape index: {}]   ;;  %s867_s4 = inlined_call_operand.vmem [shape: f32[1,128], index: 4, kind: input, shape index: {}]   ;;  %s868_s5 = inlined_call_operand.hbm [shape: bf16[128,128], index: 5, kind: input, shape index: {}]   ;;  %s869_s6 = inlined_call_operand.vmem [shape: f32[1,128], index: 6, kind: input, shape index: {}]   ;;  %s870_s7 = inlined_call_operand.hbm [shape: f32[8,128], index: 7, kind: output, shape index: {}]  }
   0x1   :  { %13 = vsyncpa [#allocation6], 0 }
   0x2   :  { %14 = vsyncpa [#allocation9], 0 }
   0x3   :  { %15 = vsyncpa [#allocation4], 0  ;;  %s706_s24 = smov [#allocation5]   ;;  %s588_s28 = scalar_lea.hbm %s864_s1, 1024 }
   0x4   :  { %s31_s25 = sshll.u32 %s706_s24, 4  ;;  %p589_p0 = scmp.ne.s32.totalorder %s864_s1, %s588_s28  ;;  %s32_s25 = int_to_ptr.vmem [resolvable:$true] %s31_s25 }
   0x5   :  { %p592_p1 = scmp.lt.u32.totalorder %s588_s28, %s864_s1 }
   0x7   :  { %p594_p2 = pnand %p592_p1, %p589_p0 }
   0x9   :  { %597 = shalt.err (!%p594_p2)
}
   0xa   :  { %s598_s10 = scalar_lea.vmem %s32_s25, 1024  ;;  %p603_p4 = scmp.lt.s32.totalorder %s32_s25, %s32_s25 }
   0xb   :  { %p599_p3 = scmp.ne.s32.totalorder %s32_s25, %s598_s10  ;;  %p604_p5 = scmp.lt.s32.totalorder %s598_s10, %s598_s10 }
   0xd   :  { %p605_p6 = por %p604_p5, %p603_p4 }
   0xf   :  { %p606_p7 = pnand %p605_p6, %p599_p3 }
  0x11   :  { %609 = shalt.err (!%p606_p7)
}
  0x12   :  { %s707_s11 = smov 64   ;;  %s708_s12 = smov 4  }
  0x13   :  { %37 = dma.hbm_to_vmem [thread:$0]  %s864_s1, 1024, %s32_s25, [#allocation6], %s707_s11, %s707_s11, %s708_s12  }
  0x14   :  { %s709_s15 = smov [#allocation2]   ;;  %s710_s17 = smov [#allocation7]  }
  0x15   :  { %s22_s16 = sshll.u32 %s709_s15, 4  ;;  %s45_s18 = sshll.u32 %s710_s17, 4  ;;  %s23_s16 = int_to_ptr.vmem [resolvable:$true] %s22_s16  ;;  %s46_s18 = int_to_ptr.vmem [resolvable:$true] %s45_s18 }
  0x16   :  { %s610_s21 = scalar_lea.hbm %s863_s0, 64 }
  0x17   :  { %p611_p8 = scmp.ne.s32.totalorder %s863_s0, %s610_s21  ;;  %p614_p9 = scmp.lt.u32.totalorder %s610_s21, %s863_s0 }
  0x19   :  { %p616_p10 = pnand %p614_p9, %p611_p8 }
  0x1b   :  { %619 = shalt.err (!%p616_p10)
}
  0x1c   :  { %s620_s1 = scalar_lea.vmem %s23_s16, 64  ;;  %p625_p12 = scmp.lt.s32.totalorder %s23_s16, %s23_s16 }
  0x1d   :  { %p621_p11 = scmp.ne.s32.totalorder %s23_s16, %s620_s1  ;;  %p626_p13 = scmp.lt.s32.totalorder %s620_s1, %s620_s1 }
  0x1f   :  { %p627_p0 = por %p626_p13, %p625_p12 }
  0x21   :  { %p628_p1 = pnand %p627_p0, %p621_p11 }
  0x23   :  { %631 = shalt.err (!%p628_p1)
}
  0x24   :  { %25 = dma.hbm_to_vmem [thread:$0]  %s863_s0, 64, %s23_s16, [#allocation3]  }
  0x25   :  { %s632_s30 = scalar_lea.hbm %s866_s3, 1024 }
  0x26   :  { %p633_p2 = scmp.ne.s32.totalorder %s866_s3, %s632_s30  ;;  %p636_p3 = scmp.lt.u32.totalorder %s632_s30, %s866_s3 }
  0x28   :  { %p638_p4 = pnand %p636_p3, %p633_p2 }
  0x2a   :  { %641 = shalt.err (!%p638_p4)
}
  0x2b   :  { %s642_s14 = scalar_lea.vmem %s46_s18, 1024  ;;  %p647_p6 = scmp.lt.s32.totalorder %s46_s18, %s46_s18 }
  0x2c   :  { %p643_p5 = scmp.ne.s32.totalorder %s46_s18, %s642_s14  ;;  %p648_p7 = scmp.lt.s32.totalorder %s642_s14, %s642_s14 }
  0x2e   :  { %p649_p8 = por %p648_p7, %p647_p6 }
  0x30   :  { %p650_p9 = pnand %p649_p8, %p643_p5 }
  0x32   :  { %653 = shalt.err (!%p650_p9)
}
  0x33   :  { %51 = dma.hbm_to_vmem [thread:$0]  %s866_s3, 1024, %s46_s18, [#allocation6], %s707_s11, %s707_s11, %s708_s12  }
  0x34   :  { %s711_s16 = smov [#allocation8]   ;;  %s654_s21 = scalar_lea.hbm %s868_s5, 1024 }
  0x35   :  { %s59_s17 = sshll.u32 %s711_s16, 4  ;;  %p655_p10 = scmp.ne.s32.totalorder %s868_s5, %s654_s21  ;;  %s60_s17 = int_to_ptr.vmem [resolvable:$true] %s59_s17 }
  0x36   :  { %p658_p11 = scmp.lt.u32.totalorder %s654_s21, %s868_s5 }
  0x38   :  { %p660_p12 = pnand %p658_p11, %p655_p10 }
  0x3a   :  { %663 = shalt.err (!%p660_p12)
}
  0x3b   :  { %s664_s1 = scalar_lea.vmem %s60_s17, 1024  ;;  %p669_p0 = scmp.lt.s32.totalorder %s60_s17, %s60_s17 }
  0x3c   :  { %p665_p13 = scmp.ne.s32.totalorder %s60_s17, %s664_s1  ;;  %p670_p1 = scmp.lt.s32.totalorder %s664_s1, %s664_s1 }
  0x3e   :  { %p671_p2 = por %p670_p1, %p669_p0 }
  0x40   :  { %p672_p3 = pnand %p671_p2, %p665_p13 }
  0x42   :  { %675 = shalt.err (!%p672_p3)
}
  0x43   :  { %65 = dma.hbm_to_vmem [thread:$0]  %s868_s5, 1024, %s60_s17, [#allocation9], %s707_s11, %s707_s11, %s708_s12  }
  0x44   :  { %698 = dma.done.wait [#allocation3], 64  }
  0x45   :  { %699 = vsyncadd [#allocation3], 4294967232 }
  0x46   :  { %700 = dma.done.wait [#allocation6], 2048  }
  0x47   :  { %701 = vsyncadd [#allocation6], 4294965248 }
  0x48   :  { %702 = dma.done.wait [#allocation9], 1024  }
  0x49   :  { %703 = vsyncadd [#allocation9], 4294966272  ;;  %v712_v0 = vmov 0.0   ;;  %vm713_vm0 = vmmov 0   ;;  %v560_v1 = vld [vmem:[#allocation5] sm:$0xff]   ;;  %v561_v2 = vld [vmem:[#allocation5 + $0x8] sm:$0xff]  }
  0x4a   :  { %491 = vmatprep.subr.bf16.mxu0 %v712_v0  ;;  %507 = vmatprep.mubr.msk.bf16.mxu0 %vm713_vm0, %v712_v0  ;;  %v562_v3 = vld [vmem:[#allocation5 + $0x10] sm:$0xff]   ;;  %v568_v4 = vld [vmem:[#allocation7] sm:$0xff]   ;;  %v563_v5 = vld [vmem:[#allocation5 + $0x18] sm:$0xff]   ;;  %s714_s28 = smov [#allocation10]  }
  0x4b   :  { %511 = vmatprep.subr.bf16.mxu1 %v712_v0  ;;  %527 = vmatprep.mubr.msk.bf16.mxu1 %vm713_vm0, %v712_v0  ;;  %v569_v6 = vld [vmem:[#allocation7 + $0x8] sm:$0xff]   ;;  %v564_v7 = vld [vmem:[#allocation5 + $0x20] sm:$0xff]   ;;  %v570_v8 = vld [vmem:[#allocation7 + $0x10] sm:$0xff]   ;;  %s426_s29 = sshll.u32 %s714_s28, 4  ;;  %s427_s29 = int_to_ptr.vmem [resolvable:$true] %s426_s29 }
  0x4c   :  { %492 = vmatpush3.bf16.msra.mxu0 %v560_v1  ;;  %512 = vmatpush3.bf16.msra.mxu1 %v568_v4  ;;  %v565_v9 = vld [vmem:[#allocation5 + $0x28] sm:$0xff]   ;;  %v571_v10 = vld [vmem:[#allocation7 + $0x18] sm:$0xff]   ;;  %v566_v11 = vld [vmem:[#allocation5 + $0x30] sm:$0xff]   ;;  %p681_p5 = scmp.lt.s32.totalorder %s427_s29, %s427_s29 }
  0x4d   :  { %493 = vmatprep.subr.bf16.mxu0 %v712_v0  ;;  %513 = vmatprep.subr.bf16.mxu1 %v712_v0  ;;  %v567_v12 = vld [vmem:[#allocation5 + $0x38] sm:$0xff]   ;;  %v572_v14 = vld [vmem:[#allocation7 + $0x20] sm:$0xff]   ;;  %v573_v15 = vld [vmem:[#allocation7 + $0x28] sm:$0xff]  }
  0x4e   :  { %v81_v13 = vld [vmem:[#allocation2] sm:$0xf]  ;;  %v574_v16 = vld [vmem:[#allocation7 + $0x30] sm:$0xff]   ;;  %v576_v18 = vld [vmem:[#allocation8] sm:$0xff]  }
  0x4f   :  { %v575_v17 = vld [vmem:[#allocation7 + $0x38] sm:$0xff]   ;;  %v577_v19 = vld [vmem:[#allocation8 + $0x8] sm:$0xff]   ;;  %v578_v20 = vld [vmem:[#allocation8 + $0x10] sm:$0xff]  }
  0x50   :  { %494 = vmatpush3.bf16.msra.mxu0 %v561_v2  ;;  %514 = vmatpush3.bf16.msra.mxu1 %v569_v6  ;;  %v579_v21 = vld [vmem:[#allocation8 + $0x18] sm:$0xff]   ;;  %v580_v30 = vld [vmem:[#allocation8 + $0x20] sm:$0xff]   ;;  %v581_v31 = vld [vmem:[#allocation8 + $0x28] sm:$0xff]  }
  0x51   :  { %495 = vmatprep.subr.bf16.mxu0 %v712_v0  ;;  %515 = vmatprep.subr.bf16.mxu1 %v712_v0  ;;  %v437_v22 = vld [vmem:[%s865_s2] ss:$0 sm:$0xff]  ;;  %v582_v32 = vld [vmem:[#allocation8 + $0x30] sm:$0xff]  }
  0x52   :  { %v583_v33 = vld [vmem:[#allocation8 + $0x38] sm:$0xff]  }
  0x53   :  { %v446_v34 = vld [vmem:[%s867_s4] ss:$0 sm:$0xff]  ;;  %s676_s4 = scalar_lea.vmem %s427_s29, 128 }
  0x54   :  { %496 = vmatpush3.bf16.msra.mxu0 %v562_v3  ;;  %516 = vmatpush3.bf16.msra.mxu1 %v570_v8  ;;  %v455_v42 = vld [vmem:[%s869_s6] ss:$0 sm:$0xff]  ;;  %p677_p4 = scmp.ne.s32.totalorder %s427_s29, %s676_s4  ;;  %p682_p6 = scmp.lt.s32.totalorder %s676_s4, %s676_s4 }
  0x55   :  { %497 = vmatprep.subr.bf16.mxu0 %v712_v0  ;;  %517 = vmatprep.subr.bf16.mxu1 %v712_v0 }
  0x56   :  { %p683_p7 = por %p682_p6, %p681_p5 }
  0x58   :  { %498 = vmatpush3.bf16.msra.mxu0 %v563_v5  ;;  %518 = vmatpush3.bf16.msra.mxu1 %v571_v10  ;;  %p684_p8 = pnand %p683_p7, %p677_p4 }
  0x59   :  { %499 = vmatprep.subr.bf16.mxu0 %v712_v0  ;;  %519 = vmatprep.subr.bf16.mxu1 %v712_v0 }
  0x5c   :  { %500 = vmatpush3.bf16.msra.mxu0 %v564_v7  ;;  %520 = vmatpush3.bf16.msra.mxu1 %v572_v14 }
  0x5d   :  { %501 = vmatprep.subr.bf16.mxu0 %v712_v0  ;;  %521 = vmatprep.subr.bf16.mxu1 %v712_v0 }
  0x60   :  { %502 = vmatpush3.bf16.msra.mxu0 %v565_v9  ;;  %522 = vmatpush3.bf16.msra.mxu1 %v573_v15 }
  0x61   :  { %503 = vmatprep.subr.bf16.mxu0 %v712_v0  ;;  %523 = vmatprep.subr.bf16.mxu1 %v712_v0 }
  0x64   :  { %504 = vmatpush3.bf16.msra.mxu0 %v566_v11  ;;  %524 = vmatpush3.bf16.msra.mxu1 %v574_v16 }
  0x65   :  { %505 = vmatprep.subr.bf16.mxu0 %v712_v0  ;;  %525 = vmatprep.subr.bf16.mxu1 %v712_v0 }
  0x68   :  { %506 = vmatpush3.bf16.msra.mxu0 %v567_v12  ;;  %526 = vmatpush3.bf16.msra.mxu1 %v575_v17 }
  0x69   :  { %531 = vmatprep.subr.bf16.mxu0 %v712_v0 }
  0x6b   :  { %508 = vmatmul.mubr.bf16.vlgmr.msra.gmra.mrb[0].mxu0 %v81_v13 }
  0x6c   :  { %547 = vmatprep.mubr.msk.bf16.mxu0 %vm713_vm0, %v712_v0  ;;  %532 = vmatpush3.bf16.msra.mxu0 %v576_v18 }
  0x6d   :  { %533 = vmatprep.subr.bf16.mxu0 %v712_v0 }
  0x70   :  { %534 = vmatpush3.bf16.msra.mxu0 %v577_v19 }
  0x71   :  { %535 = vmatprep.subr.bf16.mxu0 %v712_v0 }
  0x74   :  { %536 = vmatpush3.bf16.msra.mxu0 %v578_v20 }
  0x75   :  { %537 = vmatprep.subr.bf16.mxu0 %v712_v0 }
  0x78   :  { %538 = vmatpush3.bf16.msra.mxu0 %v579_v21 }
  0x79   :  { %539 = vmatprep.subr.bf16.mxu0 %v712_v0 }
  0x7c   :  { %540 = vmatpush3.bf16.msra.mxu0 %v580_v30 }
  0x7d   :  { %541 = vmatprep.subr.bf16.mxu0 %v712_v0 }
  0x80   :  { %542 = vmatpush3.bf16.msra.mxu0 %v581_v31 }
  0x81   :  { %543 = vmatprep.subr.bf16.mxu0 %v712_v0 }
  0x84   :  { %544 = vmatpush3.bf16.msra.mxu0 %v582_v32 }
  0x85   :  { %545 = vmatprep.subr.bf16.mxu0 %v712_v0 }
  0x88   :  { %546 = vmatpush3.bf16.msra.mxu0 %v583_v33 }
 0x13e   :  { %v187_v23 = vpop.f32.mrb[0].mxu0 }
 0x13f   :  { %v188_v24 = vadd.f32 %v437_v22, %v187_v23  ;;  %v509_v25 = vpop.f32.mrb[1].mxu0 }
 0x140   :  { %v190_v26 = vpop.f32.mrb[2].mxu0 }
 0x141   :  { %584 = vtanh.f32 %v188_v24  ;;  %v510_v27 = vpop.f32.mrb[3].mxu0 }
 0x14b   :  { %v585_v28 = vpop.eup %584 }
 0x14c   :  { %v194_v29 = vpack.c.bf16 %v585_v28, %v585_v28 }
 0x14e   :  { %528 = vmatmul.mubr.bf16.vlgmr.msra.gmra.mrb[0].mxu1 %v194_v29 }
 0x221   :  { %v300_v35 = vpop.f32.mrb[0].mxu1 }
 0x222   :  { %v301_v36 = vadd.f32 %v446_v34, %v300_v35  ;;  %v529_v37 = vpop.f32.mrb[1].mxu1 }
 0x223   :  { %v303_v38 = vpop.f32.mrb[2].mxu1 }
 0x224   :  { %586 = vtanh.f32 %v301_v36  ;;  %v530_v39 = vpop.f32.mrb[3].mxu1 }
 0x22e   :  { %v587_v40 = vpop.eup %586 }
 0x22f   :  { %v307_v41 = vpack.c.bf16 %v587_v40, %v587_v40 }
 0x231   :  { %548 = vmatmul.mubr.bf16.vlgmr.msra.gmra.mrb[4].mxu0 %v307_v41 }
 0x304   :  { %v413_v43 = vpop.f32.mrb[4].mxu0 }
 0x305   :  { %v414_v44 = vadd.f32 %v455_v42, %v413_v43  ;;  %v549_v45 = vpop.f32.mrb[5].mxu0 }
 0x306   :  { %v416_v46 = vpop.f32.mrb[6].mxu0 }
 0x307   :  { %419 = vst [vmem:[#allocation10] sm:$0xff] %v414_v44  ;;  %v550_v47 = vpop.f32.mrb[7].mxu0 }
 0x308   :  { %687 = shalt.err (!%p684_p8)
}
 0x309   :  { %s688_s6 = scalar_lea.hbm %s870_s7, 128 }
 0x30a   :  { %p689_p9 = scmp.ne.s32.totalorder %s870_s7, %s688_s6  ;;  %p692_p10 = scmp.lt.u32.totalorder %s688_s6, %s870_s7 }
 0x30c   :  { %p694_p11 = pnand %p692_p10, %p689_p9 }
 0x30e   :  { %697 = shalt.err (!%p694_p11)
}
 0x30f   :  { %429 = dma.vmem_to_hbm [thread:$0]  %s427_s29, 128, %s870_s7, [#allocation4]  }
 0x310   :  { %704 = dma.done.wait [#allocation4], 128  }
 0x311   :  { %705 = vsyncadd [#allocation4], 4294967168 }
 0x312   :  { %433 = vsyncpa [#allocation3], 1 }
 0x313   :  { %434 = vsyncpa [#allocation6], 1 }
 0x314   :  { %435 = vsyncpa [#allocation9], 1 }
 0x315   :  { %436 = vsyncpa [#allocation4], 1 }

</bundles_post_ra>
